<compile_context>
chip_gen: v7x
topology: tpu7x:2x2x1
jax: 0.10.0
libtpu: 0.0.40
codegen_flags: <defaults>
</compile_context>

<pallas_src>
import functools

import jax
import jax.numpy as jnp
from jax.experimental import pallas as pl
from jax.experimental.pallas import tpu as pltpu


def _round_up(a, b):
    return ((a + b - 1) // b) * b


def _largest_div_tile(size, cap):
    """Largest multiple of 128 that divides `size` (a 128-multiple) and <= cap."""
    best = 128
    t = 256
    lim = min(cap, size)
    while t <= lim:
        if size % t == 0:
            best = t
        t += 128
    return best


@functools.lru_cache(maxsize=1)
def _vmem_limit_bytes():
    # v7x has only 64 MiB VMEM per TensorCore; v5e/v6e have 128 MiB physical.
    try:
        kind = jax.devices()[0].device_kind.lower()
    except Exception:  # defensive fallback
        return 48 * 1024 * 1024
    if "v7" in kind:
        return 44 * 1024 * 1024
    return 64 * 1024 * 1024


# -----------------------------------------------------------------------------
# Pre-pass kernel (large-M path): S = (mat + mat.T) * 0.5   (HBM-bound, O(N^2))
# -----------------------------------------------------------------------------
def _symmetrize_kernel(a_ref, at_ref, o_ref):
    # o[i-tile, j-tile] = 0.5 * (A[i-tile, j-tile] + A[j-tile, i-tile].T)
    o_ref[...] = ((a_ref[...] + at_ref[...].T) * 0.5).astype(o_ref.dtype)


def _symmetrize(mat_padded, ts):
    n_pad = mat_padded.shape[0]
    grid = (n_pad // ts, n_pad // ts)
    return pl.pallas_call(
        _symmetrize_kernel,
        out_shape=jax.ShapeDtypeStruct((n_pad, n_pad), mat_padded.dtype),
        grid_spec=pltpu.PrefetchScalarGridSpec(
            num_scalar_prefetch=0,
            grid=grid,
            in_specs=[
                pl.BlockSpec((ts, ts), lambda i, j: (i, j)),
                pl.BlockSpec((ts, ts), lambda i, j: (j, i)),
            ],
            out_specs=pl.BlockSpec((ts, ts), lambda i, j: (i, j)),
        ),
        compiler_params=pltpu.CompilerParams(
            dimension_semantics=("parallel", "parallel"),
            vmem_limit_bytes=_vmem_limit_bytes(),
        ),
    )(mat_padded, mat_padded)


# -----------------------------------------------------------------------------
# Main kernels: out = S @ x   (one MXU dot per (i, j, k) grid step)
# -----------------------------------------------------------------------------
def _accumulate(s, x_ref, o_ref, scratch, *, single_k, direct):
    contrib = jnp.dot(s, x_ref[...], preferred_element_type=jnp.float32)
    if single_k:
        # K grid of 1: no init / accumulate path at all.
        o_ref[...] = contrib.astype(o_ref.dtype)
        return

    # f32 outputs accumulate directly into the k-resident output block;
    # other dtypes use an f32 VMEM scratch and cast once at the end.
    acc_ref = o_ref if direct else scratch[0]
    k = pl.program_id(2)

    @pl.when(k == 0)
    def _():
        acc_ref[...] = jnp.zeros_like(acc_ref)

    acc_ref[...] += contrib

    if not direct:
        @pl.when(k == pl.num_programs(2) - 1)
        def _():
            o_ref[...] = acc_ref[...].astype(o_ref.dtype)


def _matmul_kernel(s_ref, x_ref, o_ref, *scratch, single_k, direct):
    _accumulate(s_ref[...], x_ref, o_ref, scratch,
                single_k=single_k, direct=direct)


def _fused_sym_matmul_kernel(a_ref, at_ref, x_ref, o_ref, *scratch,
                             single_k, direct):
    # Small-M path: symmetrize in-kernel, skip the S HBM round trip.
    s = (a_ref[...] + at_ref[...].T) * 0.5
    _accumulate(s, x_ref, o_ref, scratch, single_k=single_k, direct=direct)


# -----------------------------------------------------------------------------
# Wrapper
# -----------------------------------------------------------------------------
@functools.partial(jax.jit, static_argnames=("tm_max", "tn_max", "tk_max"))
def sym_linear(mat, x, *, tm_max=512, tn_max=1024, tk_max=512):
    n, n2 = mat.shape
    assert n == n2, "SymLinear requires a square matrix"
    x_was_1d = x.ndim == 1
    if x_was_1d:
        x = x[:, None]
    assert x.ndim == 2 and x.shape[0] == n, "x must be (N, M) (or (N,))"
    m = x.shape[1]

    compute_dtype = jnp.result_type(mat.dtype, x.dtype)
    out_dtype = compute_dtype
    direct = out_dtype == jnp.float32  # accumulate straight into the output

    # --- tiling -----------------------------------------------------------
    # N: pad only to a multiple of 128; tm/tk must divide n_pad so the
    # quadratically expensive dimension is never inflated beyond 128.
    n_pad = _round_up(n, 128)
    tm = _largest_div_tile(n_pad, tm_max)
    tk = _largest_div_tile(n_pad, tk_max)

    # M: prefer the largest exact-divisor tile; if that tile would be tiny
    # and a 512-wide tile costs <= 25% extra padded columns, take the wider
    # lane-dense tile (higher arithmetic intensity, fewer S panel re-reads).
    m_pad = _round_up(m, 128)
    tn = _largest_div_tile(m_pad, tn_max)
    if tn < 512 and tn_max >= 512 and m_pad > 512:
        m_pad_512 = _round_up(m_pad, 512)
        if m_pad_512 - m_pad <= m_pad // 4:
            tn, m_pad = 512, m_pad_512

    # v7x megacore: ensure at least one "parallel" grid axis has >= 2 blocks
    # so the second TensorCore is not idle on small problems.
    if n_pad // tm == 1 and m_pad // tn == 1:
        if n_pad >= 256:
            tm = _largest_div_tile(n_pad, n_pad // 2)
        elif m_pad >= 256:
            tn = _largest_div_tile(m_pad, m_pad // 2)

    nk = n_pad // tk
    single_k = nk == 1
    fuse_symmetrize = (m_pad // tn) <= 2  # small-M: skip the S pre-pass

    # --- zero padding (zero K tail => correct accumulation, no masking) ----
    mat_p = mat.astype(compute_dtype)
    if n_pad != n:
        mat_p = jnp.pad(mat_p, ((0, n_pad - n), (0, n_pad - n)))
    x_p = x.astype(compute_dtype)
    if n_pad != n or m_pad != m:
        x_p = jnp.pad(x_p, ((0, n_pad - n), (0, m_pad - m)))

    # --- kernel dispatch ----------------------------------------------------
    if fuse_symmetrize:
        kernel = functools.partial(
            _fused_sym_matmul_kernel, single_k=single_k, direct=direct)
        in_specs = [
            pl.BlockSpec((tm, tk), lambda i, j, k: (i, k)),   # A[i, k]
            pl.BlockSpec((tk, tm), lambda i, j, k: (k, i)),   # A[k, i] -> .T
            pl.BlockSpec((tk, tn), lambda i, j, k: (k, j)),   # x[k, j]
        ]
        operands = (mat_p, mat_p, x_p)
        mat_reads_per_col_tile = 2
    else:
        ts = _largest_div_tile(n_pad, 512)  # HBM-bound pre-pass: big tiles
        s_p = _symmetrize(mat_p, ts)
        kernel = functools.partial(
            _matmul_kernel, single_k=single_k, direct=direct)
        in_specs = [
            pl.BlockSpec((tm, tk), lambda i, j, k: (i, k)),   # S[i, k]
            pl.BlockSpec((tk, tn), lambda i, j, k: (k, j)),   # x[k, j]
        ]
        operands = (s_p, x_p)
        mat_reads_per_col_tile = 1

    scratch_shapes = [] if direct else [pltpu.VMEM((tm, tn), jnp.float32)]

    itemsize = jnp.dtype(compute_dtype).itemsize
    cost = pl.CostEstimate(
        flops=2 * n_pad * n_pad * m_pad,
        transcendentals=0,
        bytes_accessed=itemsize * (
            mat_reads_per_col_tile * n_pad * n_pad * (m_pad // tn)
            + n_pad * m_pad * (n_pad // tm)
            + n_pad * m_pad),
    )

    grid = (n_pad // tm, m_pad // tn, nk)
    out_p = pl.pallas_call(
        kernel,
        out_shape=jax.ShapeDtypeStruct((n_pad, m_pad), out_dtype),
        grid_spec=pltpu.PrefetchScalarGridSpec(
            num_scalar_prefetch=0,
            grid=grid,
            in_specs=in_specs,
            out_specs=pl.BlockSpec((tm, tn), lambda i, j, k: (i, j)),
            scratch_shapes=scratch_shapes,
        ),
        compiler_params=pltpu.CompilerParams(
            dimension_semantics=("parallel", "parallel", "arbitrary"),
            vmem_limit_bytes=_vmem_limit_bytes(),
        ),
        cost_estimate=cost,
    )(*operands)

    # Mandatory slice back to the logical shape: padded rows/cols are zeros
    # and must never leak to consumers.
    out = out_p
    if n_pad != n or m_pad != m:
        out = out_p[:n, :m]
    if x_was_1d:
        out = out[:, 0]
    return out


def sym_linear_ref(mat, x):
    hi = jax.lax.Precision.HIGHEST
    return (jnp.matmul(mat, x, precision=hi)
            + jnp.matmul(mat.T, x, precision=hi)) / 2


if __name__ == "__main__":
    key = jax.random.PRNGKey(0)
    keys = jax.random.split(key, 6)

    # Case 1: tile-aligned small problem -> fused small-M path, megacore
    # row-axis split (grid (2,1,1)), single-K fast path.
    N1, M1 = 256, 256
    mat1 = jax.random.normal(keys[0], (N1, N1), dtype=jnp.float32)
    x1 = jax.random.normal(keys[1], (N1, M1), dtype=jnp.float32)
    out1 = jax.block_until_ready(sym_linear(mat1, x1))
    ref1 = sym_linear_ref(mat1, x1)
    assert out1.shape == (N1, M1)
    assert jnp.allclose(out1, ref1, atol=1e-3, rtol=1e-3), "case 1 mismatch"

    # Case 2: ragged (non-128-multiple) shapes -> zero-padded tails + slice.
    N2, M2 = 200, 136
    mat2 = jax.random.normal(keys[2], (N2, N2), dtype=jnp.float32)
    x2 = jax.random.normal(keys[3], (N2, M2), dtype=jnp.float32)
    out2 = jax.block_until_ready(sym_linear(mat2, x2))
    ref2 = sym_linear_ref(mat2, x2)
    assert out2.shape == (N2, M2)
    assert jnp.allclose(out2, ref2, atol=1e-3, rtol=1e-3), "case 2 mismatch"

    # Case 3: small tile caps force the symmetrize pre-pass (>2 column tiles)
    # plus a multi-step K reduction with direct f32 accumulation into o_ref.
    N3, M3 = 384, 512
    mat3 = jax.random.normal(keys[4], (N3, N3), dtype=jnp.float32)
    x3 = jax.random.normal(keys[5], (N3, M3), dtype=jnp.float32)
    out3 = jax.block_until_ready(
        sym_linear(mat3, x3, tm_max=128, tn_max=128, tk_max=128))
    ref3 = sym_linear_ref(mat3, x3)
    assert out3.shape == (N3, M3)
    assert jnp.allclose(out3, ref3, atol=1e-3, rtol=1e-3), "case 3 mismatch"

    print("KERNEL_OK")
</pallas_src>

<mosaic_0001>
module attributes {stable_mosaic.version = 11 : i64} {
  func.func @_fused_sym_matmul_kernel(%arg0: i32, %arg1: i32, %arg2: i32, %arg3: memref<128x256xf32, #tpu.memory_space<vmem>>, %arg4: memref<256x128xf32, #tpu.memory_space<vmem>>, %arg5: memref<256x256xf32, #tpu.memory_space<vmem>>, %arg6: memref<128x256xf32, #tpu.memory_space<vmem>>) attributes {dimension_semantics = [#tpu.dimension_semantics<parallel>, #tpu.dimension_semantics<parallel>, #tpu.dimension_semantics<arbitrary>], iteration_bounds = array<i64: 2, 1, 1>, scalar_prefetch = 0 : i64, scratch_operands = 0 : i64, tpu.core_type = #tpu.core_type<tc>, window_params = [{transform_indices = @transform_0, window_bounds = array<i64: 128, 256>}, {transform_indices = @transform_1, window_bounds = array<i64: 256, 128>}, {transform_indices = @transform_2, window_bounds = array<i64: 256, 256>}, {transform_indices = @transform_3, window_bounds = array<i64: 128, 256>}]} {
    %c0 = arith.constant 0 : index
    %c0_0 = arith.constant 0 : index
    %0 = vector.load %arg3[%c0, %c0_0] : memref<128x256xf32, #tpu.memory_space<vmem>>, vector<128x256xf32>
    %c0_1 = arith.constant 0 : index
    %c0_2 = arith.constant 0 : index
    %1 = vector.load %arg4[%c0_1, %c0_2] : memref<256x128xf32, #tpu.memory_space<vmem>>, vector<256x128xf32>
    %2 = tpu.transpose %1, [1, 0] : vector<256x128xf32> -> vector<128x256xf32>
    %3 = arith.addf %0, %2 : vector<128x256xf32>
    %cst = arith.constant 5.000000e-01 : f32
    %4 = vector.broadcast %cst : f32 to vector<128x256xf32>
    %5 = arith.mulf %3, %4 : vector<128x256xf32>
    %c0_3 = arith.constant 0 : index
    %c0_4 = arith.constant 0 : index
    %6 = vector.load %arg5[%c0_3, %c0_4] : memref<256x256xf32, #tpu.memory_space<vmem>>, vector<256x256xf32>
    %cst_5 = arith.constant dense<0.000000e+00> : vector<128x256xf32>
    %7 = tpu.matmul %5, %6, %cst_5 {dimension_numbers = #tpu.dot_dimension_numbers<[1], [0], [0], [1], [0, 0, 1, 1], [], []>} : vector<128x256xf32>, vector<256x256xf32>, vector<128x256xf32> -> vector<128x256xf32>
    %c0_6 = arith.constant 0 : index
    %c0_7 = arith.constant 0 : index
    %8 = vector.load %arg6[%c0_6, %c0_7] : memref<128x256xf32, #tpu.memory_space<vmem>>, vector<128x256xf32>
    tpu.vector_store %arg6[%c0_6, %c0_7], %7 {strides = array<i32>} : memref<128x256xf32, #tpu.memory_space<vmem>>, vector<128x256xf32>,
    return
  }
  func.func @transform_0(%arg0: i32, %arg1: i32, %arg2: i32) -> (i32, i32) {
    %c0_i32 = arith.constant 0 : i32
    return %arg0, %arg2 : i32, i32
  }
  func.func @transform_1(%arg0: i32, %arg1: i32, %arg2: i32) -> (i32, i32) {
    %c0_i32 = arith.constant 0 : i32
    return %arg2, %arg0 : i32, i32
  }
  func.func @transform_2(%arg0: i32, %arg1: i32, %arg2: i32) -> (i32, i32) {
    %c0_i32 = arith.constant 0 : i32
    return %arg2, %arg1 : i32, i32
  }
  func.func @transform_3(%arg0: i32, %arg1: i32, %arg2: i32) -> (i32, i32) {
    %c0_i32 = arith.constant 0 : i32
    return %arg0, %arg1 : i32, i32
  }
}

</mosaic_0001>

<bundles_post_ra>
// kernel: sym_linear.1
= control target key start
LH: loop header
LB: loop body
LE: loop exit
PB: predicated region body
PF: predicated region fallthrough
CT: control target
= control target key end

     0   :  { %s1679_s0 = inlined_call_operand.hbm [shape: f32[256,256], index: 0, kind: input, shape index: {}, may-alias: {0,1}]   ;;  %s1680_s1 = inlined_call_operand.hbm [shape: f32[256,256], index: 1, kind: input, shape index: {}, may-alias: {0,1}]   ;;  %s1681_s2 = inlined_call_operand.hbm [shape: f32[256,256], index: 2, kind: input, shape index: {}]   ;;  %s1682_s3 = inlined_call_operand.hbm [shape: f32[256,256], index: 3, kind: output, shape index: {}]  }
   0x1   :  { %1689 = sst [smem:[#allocation13_spill]] %s1681_s2 }
   0x2   :  { %8 = vsyncpa [#allocation3], 0 }
   0x3   :  { %10 = vsyncpa [#allocation3 + $0x1], 0 }
   0x4   :  { %11 = vsyncpa [#allocation6], 0 }
   0x5   :  { %13 = vsyncpa [#allocation6 + $0x1], 0 }
   0x6   :  { %14 = vsyncpa [#allocation4], 0 }
   0x7   :  { %16 = vsyncpa [#allocation4 + $0x1], 0  ;;  %s1304_s12 = smov 0   ;;  %s1306_s13 = smov 0  }
   0x8   :  { %s1308_s14 = smov 0   ;;  %s1310_s15 = smov 0  }
   0x9   :  { %s1312_s16 = smov 0   ;;  %s1314_s17 = smov 0  }
   0xa LB: > { %s1335_s18 = sadd.s32 4294967295, %s1272_s17   ;;  %s889_s19 = sadd.s32 4294967294, %s1272_s17   ;;  %s1272_s17 = sphi %s1314_s17, %s22_s17   ;;  %s1268_s16 = sphi %s1312_s16, %s1711_s16   ;;  %s1264_s15 = sphi %s1310_s15, %s1710_s15   ;;  %s1260_s14 = sphi %s1308_s14, %s1709_s14   ;;  %s1256_s13 = sphi %s1306_s13, %s1708_s13   ;;  %s1252_s12 = sphi %s1304_s12, %s1707_s12  }
   0xb   : > { %p63_p0 = scmp.ne.s32.totalorder %s1256_s13, %s1252_s12  ;;  %p1683_p1 = scmp.eq.s32.totalorder %s1335_s18, 0 }
   0xc   : > { %p151_p3 = scmp.eq.s32.totalorder %s889_s19, 1  ;;  %p890_p5 = scmp.ge.s32.totalorder %s1272_s17, 1 }
   0xd   : > { %p1344_p4 = por %p1683_p1, %p63_p0  ;;  %p158_p7 = scmp.lt.s32.totalorder %s1272_s17, 3 }
   0xe   : > { %p1349_p6 = por %p151_p3, %p63_p0  ;;  %s1274_s23 = smov [#allocation7]  }
   0xf   : > { %s1690_s20 = scalar_select %p1344_p4, 1, 0 }
  0x10   : > { %s1691_s21 = scalar_select %p1349_p6, 1, 0 }
  0x11   : > { %p1354_p8 = pnand %p890_p5, %p158_p7  ;;  %s176_s24 = sshll.u32 %s1274_s23, 4  ;;  %s177_s24 = int_to_ptr.vmem [resolvable:$true] %s176_s24 }
  0x12   : > { %s41_s26 = sadd.s32 1, %s1268_s16  ;;  %s1694_s2 = sld [smem:[#allocation13_spill]] }
  0x13   : > { %s1692_s22 = scalar_select %p1354_p8, 1, 0 }
  0x14   : > { %p1020_p9 = pneg %p1354_p8 }
  0x16   : > { %p1363_p11 = pnand %p1020_p9, %p1683_p1 }
  0x18   : > { %s1094_s29 = scalar_lea.hbm %s1694_s2, 8192  ;;  %p1096_p13 = pneg %p1363_p11 }
  0x19   : > { %p1095_p12 = scmp.ne.s32.totalorder %s1694_s2, %s1094_s29  ;;  %p1101_p5 = scmp.lt.u32.totalorder %s1094_s29, %s1694_s2 }
  0x1b   : > { %p1097_p0 = pnand %p1096_p13, %p1095_p12 }
  0x1d   : > { %p1098_p3 = pneg %p1097_p0 }
  0x1f   : > { %p1103_p7 = pnand %p1101_p5, %p1098_p3 }
  0x21   : > { %1106 = shalt.err (!%p1103_p7)
}
  0x22   : > { %s1107_s7 = scalar_lea.vmem %s177_s24, 8192  ;;  %p1115_p2 = scmp.lt.s32.totalorder %s177_s24, %s177_s24 }
  0x23   : > { %p1108_p9 = scmp.ne.s32.totalorder %s177_s24, %s1107_s7  ;;  %p1116_p6 = scmp.lt.s32.totalorder %s1107_s7, %s1107_s7 }
  0x25   : > { %p1110_p10 = pnand %p1108_p9, %p1096_p13  ;;  %p1117_p4 = por %p1116_p6, %p1115_p2 }
  0x27   : > { %p1111_p1 = pneg %p1110_p10 }
  0x29   : > { %p1118_p8 = pnand %p1117_p4, %p1111_p1 }
  0x2b   : > { %1121 = shalt.err (!%p1118_p8)
}
  0x2c   : > { %s1686_s8 = smov 256   ;;  %s1688_s9 = smov 16  }
  0x2d   : > { %1023 = dma.hbm_to_vmem [thread:$0]  (!%p1363_p11), %s1694_s2, 8192, %s177_s24, [#allocation6], %s1686_s8, %s1686_s8, %s1688_s9  }
  0x2e   : > { %p43_p1 = scmp.ge.s32.totalorder %s41_s26, 2  ;;  %s50_s19 = sadd.s32 1, %s1260_s14 }
  0x2f   : > { %p57_p2 = scmp.ne.s32.totalorder %s1260_s14, %s1256_s13  ;;  %p58_p4 = scmp.eq.s32.totalorder %s1272_s17, 0 }
  0x30   : > { %s1713_s26 = smov (%p43_p1, %s41_s26), 0  ;;  %p1696_p8 = scmp.eq.s32.totalorder %s1335_s18, 1 }
  0x31   : > { %p1393_p6 = por %p58_p4, %p57_p2  ;;  %s45_s27 = ssub.s32 %s1268_s16, %s1713_s26 }
  0x32   : > { %p1399_p10 = por %p1696_p8, %p57_p2  ;;  %p1036_p11 = scmp.lt.s32.totalorder %s1272_s17, 2 }
  0x33   : > { %p48_p12 = scmp.eq.s32.totalorder %s45_s27, 0  ;;  %s190_s24 = sand.u32 1, %s1260_s14  }
  0x34   : > { %s893_s28 = sshll.u32 %s190_s24, 8  ;;  %s911_s30 = sshll.u32 %s1268_s16, 12 }
  0x35   : > { %s1408_s29 = scalar_select %p48_p12, %s1260_s14, %s50_s19  }
  0x36   : > { %s1414_s6 = scalar_lea.hbm %s1679_s0, %s911_s30  ;;  %s194_s7 = scalar_lea.vmem [#allocation2], %s893_s28 }
  0x37   : > { %s204_s10 = sshll.u32 %s194_s7, 4  ;;  %p1420_p13 = pnand %p1036_p11, %p1393_p6  ;;  %s1416_s10 = int_to_ptr.vmem [resolvable:$true] %s204_s10 }
  0x38   : > { %s214_s19 = sand.u32 1, %s1272_s17   ;;  %s218_s27 = scalar_lea.vmem [#allocation5], %s893_s28 }
  0x39   : > { %s1425_s4 = sshll.u32 %s218_s27, 4  ;;  %s1427_s30 = scalar_lea.sflag [#allocation3], %s190_s24  ;;  %s1459_s4 = int_to_ptr.vmem [resolvable:$true] %s1425_s4 }
  0x3a   : > { %s1122_s5 = scalar_lea.hbm %s1414_s6, 4096  ;;  %p1124_p3 = pneg %p1420_p13 }
  0x3b   : > { %p1123_p0 = scmp.ne.s32.totalorder %s1414_s6, %s1122_s5  ;;  %s1127_s8 = scalar_lea.hbm %s1679_s0, 8192 }
  0x3c   : > { %p1128_p9 = scmp.lt.u32.totalorder %s1414_s6, %s1679_s0  ;;  %p1129_p1 = scmp.lt.u32.totalorder %s1127_s8, %s1122_s5 }
  0x3d   : > { %p1125_p5 = pnand %p1124_p3, %p1123_p0  ;;  %p1131_p4 = scmp.lt.u32.totalorder %s1122_s5, %s1414_s6 }
  0x3e   : > { %p1130_p2 = por %p1129_p1, %p1128_p9 }
  0x3f   : > { %p1126_p7 = pneg %p1125_p5 }
  0x40   : > { %p1132_p6 = por %p1131_p4, %p1130_p2 }
  0x42   : > { %p1133_p8 = pnand %p1132_p6, %p1126_p7 }
  0x44   : > { %1136 = shalt.err (!%p1133_p8)
}
  0x45   : > { %s1137_s24 = scalar_lea.vmem %s1416_s10, 4096  ;;  %s1277_s28 = smov [#allocation2]  }
  0x46   : > { %p1138_p11 = scmp.ne.s32.totalorder %s1416_s10, %s1137_s24  ;;  %s1142_s27 = sshll.u32 %s1277_s28, 4  ;;  %s1143_s27 = int_to_ptr.vmem [resolvable:$false] %s1142_s27 }
  0x47   : > { %s1144_s2 = scalar_lea.vmem %s1143_s27, 8192  ;;  %p1145_p5 = scmp.lt.s32.totalorder %s1416_s10, %s1143_s27 }
  0x48   : > { %p1140_p12 = pnand %p1138_p11, %p1124_p3  ;;  %p1146_p9 = scmp.lt.s32.totalorder %s1144_s2, %s1137_s24 }
  0x4a   : > { %p1141_p0 = pneg %p1140_p12  ;;  %p1147_p1 = por %p1146_p9, %p1145_p5 }
  0x4c   : > { %p1148_p2 = pnand %p1147_p1, %p1141_p0 }
  0x4e   : > { %1151 = shalt.err (!%p1148_p2)
}
  0x4f   : > { %s1699_s8 = smov 16   ;;  %s1700_s9 = smov 256  }
  0x50   : > { %1027 = dma.hbm_to_vmem [thread:$0]  (!%p1420_p13), %s1414_s6, 4096, %s1416_s10, %s1427_s30, %s1700_s9, %s1700_s9, %s1699_s8  }
  0x51   : > { %s898_s5 = sshll.u32 %s1268_s16, 7  ;;  %s1469_s28 = scalar_lea.sflag [#allocation6], %s214_s19 }
  0x52   : > { %s1465_s24 = scalar_lea.hbm %s1680_s1, %s898_s5  ;;  %s1157_s30 = scalar_lea.hbm %s1680_s1, 8192 }
  0x53   : > { %s1152_s27 = scalar_lea.hbm %s1465_s24, 4096  ;;  %p1158_p8 = scmp.lt.u32.totalorder %s1465_s24, %s1680_s1 }
  0x54   : > { %p1153_p7 = scmp.ne.s32.totalorder %s1465_s24, %s1152_s27  ;;  %p1159_p11 = scmp.lt.u32.totalorder %s1157_s30, %s1152_s27 }
  0x55   : > { %p1161_p0 = scmp.lt.u32.totalorder %s1152_s27, %s1465_s24 }
  0x56   : > { %p1155_p4 = pnand %p1153_p7, %p1124_p3  ;;  %p1160_p12 = por %p1159_p11, %p1158_p8 }
  0x58   : > { %p1156_p6 = pneg %p1155_p4  ;;  %p1162_p5 = por %p1161_p0, %p1160_p12 }
  0x5a   : > { %p1163_p9 = pnand %p1162_p5, %p1156_p6 }
  0x5c   : > { %1166 = shalt.err (!%p1163_p9)
}
  0x5d   : > { %s1167_s19 = scalar_lea.vmem %s1459_s4, 4096  ;;  %s1278_s5 = smov [#allocation5]  }
  0x5e   : > { %p1168_p1 = scmp.ne.s32.totalorder %s1459_s4, %s1167_s19  ;;  %s1172_s23 = sshll.u32 %s1278_s5, 4  ;;  %s1173_s23 = int_to_ptr.vmem [resolvable:$false] %s1172_s23 }
  0x5f   : > { %s1174_s7 = scalar_lea.vmem %s1173_s23, 8192  ;;  %p1175_p4 = scmp.lt.s32.totalorder %s1459_s4, %s1173_s23 }
  0x60   : > { %p1170_p2 = pnand %p1168_p1, %p1124_p3  ;;  %p1176_p8 = scmp.lt.s32.totalorder %s1174_s7, %s1167_s19 }
  0x62   : > { %p1171_p7 = pneg %p1170_p2  ;;  %p1177_p11 = por %p1176_p8, %p1175_p4 }
  0x64   : > { %p1178_p12 = pnand %p1177_p11, %p1171_p7 }
  0x66   : > { %1181 = shalt.err (!%p1178_p12)
}
  0x67   : > { %s1279_s27 = smov 128   ;;  %s1280_s6 = smov 8  }
  0x68   : > { %1030 = dma.hbm_to_vmem [thread:$0]  (!%p1420_p13), %s1465_s24, 4096, %s1459_s4, %s1469_s28, %s1700_s9, %s1279_s27, %s1280_s6  }
  0x69   : > { %p1701_p3 = scmp.ne.s32.totalorder %s1692_s22, 0 }
  0x6a   : > { %s1499_s10 = sand.u32 (!%p1701_p3), 1, %s1256_s13   ;;  %p1702_p6 = scmp.ne.s32.totalorder (!%p1701_p3), %s1690_s20, 0 }
  0x6b   : > { %239 = sbr.rel (%p1701_p3) target bundleno = 544 (0x220), region = 32  ;;  %s1502_s30 = sshll.u32 (!%p1701_p3), %s1499_s10, 8 }
  0x6c   : > { %s242_s2 = scalar_lea.sflag (!%p1701_p3), [#allocation3], %s1499_s10  ;;  %s1506_s8 = scalar_lea.vmem (!%p1701_p3), [#allocation2], %s1502_s30 }
  0x72   : > { %1235 = dma.done.wait (%p1702_p6), %s242_s2, 4096  }
  0x73   : > { %1237 = vsyncadd (%p1702_p6), %s242_s2, 4294963200  ;;  %s250_s22 = sand.u32 1, %s1335_s18   ;;  %s1514_s4 = scalar_lea.vmem [#allocation5], %s1502_s30 }
  0x74   : > { %s251_s11 = scalar_lea.sflag [#allocation6], %s250_s22 }
  0x75   : > { %1239 = dma.done.wait (%p1702_p6), %s251_s11, 4096  }
  0x76   : > { %1241 = vsyncadd (%p1702_p6), %s251_s11, 4294963200  ;;  %p1703_p13 = scmp.eq.s32.totalorder %s1335_s18, 0 }
  0x78   : > { %1243 = dma.done.wait (%p1703_p13), [#allocation6], 8192   ;;  %p1704_p0 = pmov %p1703_p13 }
  0x79   : > { %v341_v0 = vld [vmem:[%s1514_s4 + $0x80] sm:$0xff]  ;;  %v342_v2 = vld [vmem:[%s1514_s4 + $0x88] sm:$0xff]  ;;  %v343_v4 = vld [vmem:[%s1514_s4 + $0x90] sm:$0xff]  ;;  %s1589_s18 = scalar_lea.vmem [#allocation8], %s1502_s30  ;;  %s913_s20 = sshll.u32 %s1264_s15, 12 }
  0x7a   : > { %1245 = vsyncadd (%p1704_p0), [#allocation6], 4294959104  ;;  %v325_v1 = vld [vmem:[%s1514_s4] sm:$0xff]  ;;  %389 = vxpose.xlu0.b32.start [1/16] %v341_v0, 128  ;;  %v326_v3 = vld [vmem:[%s1514_s4 + $0x8] sm:$0xff]  ;;  %s759_s9 = sshll.u32 %s1589_s18, 4  ;;  %s1626_s19 = scalar_lea.hbm %s1682_s3, %s913_s20  ;;  %s1628_s9 = int_to_ptr.vmem [resolvable:$true] %s759_s9 }
  0x7b   : > { %357 = vxpose.xlu1.b32.start [1/16] %v325_v1, 128  ;;  %v327_v5 = vld [vmem:[%s1514_s4 + $0x10] sm:$0xff]  ;;  %v344_v6 = vld [vmem:[%s1514_s4 + $0x98] sm:$0xff]  ;;  %v486_v8 = vld [vmem:[#allocation7 + $0x8] sm:$0xff]  ;;  %s743_s5 = scalar_lea.sflag [#allocation4], %s1499_s10  ;;  %s1182_s15 = scalar_lea.vmem %s1628_s9, 4096 }
  0x7c   : > { %v328_v7 = vld [vmem:[%s1514_s4 + $0x18] sm:$0xff]  ;;  %v485_v10 = vld [vmem:[#allocation7] sm:$0xff]  ;;  %v487_v11 = vld [vmem:[#allocation7 + $0x10] sm:$0xff]  ;;  %p1183_p5 = scmp.ne.s32.totalorder %s1628_s9, %s1182_s15  ;;  %s1281_s23 = smov [#allocation8]  }
  0x7d   : > { %v488_v9 = vld [vmem:[#allocation7 + $0x18] sm:$0xff]  ;;  %v916_v13 = vpack.c.bf16 %v487_v11, %v485_v10  ;;  %v490_v14 = vld [vmem:[#allocation7 + $0x28] sm:$0xff]  ;;  %v489_v16 = vld [vmem:[#allocation7 + $0x20] sm:$0xff]  ;;  %s1186_s7 = sshll.u32 %s1281_s23, 4  ;;  %s1187_s7 = int_to_ptr.vmem [resolvable:$false] %s1186_s7 }
  0x7e   : > { %390 = vxpose.xlu0.b32.cont [2/16] %v342_v2, 128  ;;  %v914_v12 = vpack.c.bf16 %v488_v9, %v486_v8  ;;  %v492_v15 = vld [vmem:[#allocation7 + $0x38] sm:$0xff]  ;;  %v491_v18 = vld [vmem:[#allocation7 + $0x30] sm:$0xff]  ;;  %v494_v19 = vld [vmem:[#allocation7 + $0x48] sm:$0xff]  ;;  %p1184_p9 = pnand %p1183_p5, %p1399_p10  ;;  %s1188_s27 = scalar_lea.vmem %s1187_s7, 8192 }
  0x7f   : > { %358 = vxpose.xlu1.b32.cont [2/16] %v326_v3, 128  ;;  %v918_v17 = vpack.c.bf16 %v492_v15, %v490_v14  ;;  %v496_v20 = vld [vmem:[#allocation7 + $0x58] sm:$0xff]  ;;  %v345_v21 = vld [vmem:[%s1514_s4 + $0xa0] sm:$0xff]  ;;  %v920_v23 = vpack.c.bf16 %v491_v18, %v489_v16  ;;  %v495_v26 = vld [vmem:[#allocation7 + $0x50] sm:$0xff]  ;;  %p1189_p2 = scmp.lt.s32.totalorder %s1628_s9, %s1187_s7  ;;  %p1190_p7 = scmp.lt.s32.totalorder %s1188_s27, %s1182_s15 }
  0x80   : > { %v329_v22 = vld [vmem:[%s1514_s4 + $0x20] sm:$0xff]  ;;  %915 = vmatprep.subr.bf16.mxu0 %v914_v12  ;;  %978 = vmatprep.subr.bf16.mxu1 %v914_v12  ;;  %v922_v24 = vpack.c.bf16 %v496_v20, %v494_v19  ;;  %v498_v27 = vld [vmem:[#allocation7 + $0x68] sm:$0xff]  ;;  %v500_v28 = vld [vmem:[#allocation7 + $0x78] sm:$0xff]  ;;  %p1185_p1 = pneg %p1184_p9 }
  0x81   : > { %917 = vmatpush1.bf16.msra.mxu0 %v916_v13  ;;  %994 = vmatpush1.bf16.msra.mxu1 %v916_v13  ;;  %v493_v25 = vld [vmem:[#allocation7 + $0x40] sm:$0xff]  ;;  %v346_v29 = vld [vmem:[%s1514_s4 + $0xa8] sm:$0xff]  ;;  %v926_v32 = vpack.c.bf16 %v500_v28, %v498_v27  ;;  %v499_v34 = vld [vmem:[#allocation7 + $0x70] sm:$0xff]  ;;  %p1191_p4 = por %p1190_p7, %p1189_p2 }
  0x82   : > { %391 = vxpose.xlu0.b32.cont [3/16] %v343_v4, 128  ;;  %919 = vmatprep.subr.bf16.mxu0 %v918_v17  ;;  %v330_v30 = vld [vmem:[%s1514_s4 + $0x28] sm:$0xff]  ;;  %v924_v31 = vpack.c.bf16 %v495_v26, %v493_v25  ;;  %v497_v33 = vld [vmem:[#allocation7 + $0x60] sm:$0xff]  ;;  %v504_v36 = vld [vmem:[#allocation7 + $0x98] sm:$0xff] }
  0x83   : > { %359 = vxpose.xlu1.b32.cont [3/16] %v327_v5, 128  ;;  %979 = vmatprep.subr.bf16.mxu1 %v918_v17  ;;  %v502_v35 = vld [vmem:[#allocation7 + $0x88] sm:$0xff]  ;;  %v347_v37 = vld [vmem:[%s1514_s4 + $0xb0] sm:$0xff]  ;;  %v928_v39 = vpack.c.bf16 %v499_v34, %v497_v33  ;;  %v501_v41 = vld [vmem:[#allocation7 + $0x80] sm:$0xff]  ;;  %p1192_p8 = pnand %p1191_p4, %p1185_p1 }
  0x84   : > { %v331_v38 = vld [vmem:[%s1514_s4 + $0x30] sm:$0xff]  ;;  %v930_v40 = vpack.c.bf16 %v504_v36, %v502_v35  ;;  %v506_v43 = vld [vmem:[#allocation7 + $0xa8] sm:$0xff]  ;;  %v508_v44 = vld [vmem:[#allocation7 + $0xb8] sm:$0xff] }
  0x85   : > { %921 = vmatpush1.bf16.msra.mxu0 %v920_v23  ;;  %995 = vmatpush1.bf16.msra.mxu1 %v920_v23  ;;  %v503_v42 = vld [vmem:[#allocation7 + $0x90] sm:$0xff]  ;;  %v348_v45 = vld [vmem:[%s1514_s4 + $0xb8] sm:$0xff]  ;;  %v934_v48 = vpack.c.bf16 %v508_v44, %v506_v43  ;;  %v505_v49 = vld [vmem:[#allocation7 + $0xa0] sm:$0xff] }
  0x86   : > { %392 = vxpose.xlu0.b32.cont [4/16] %v344_v6, 128  ;;  %923 = vmatprep.subr.bf16.mxu0 %v922_v24  ;;  %v332_v46 = vld [vmem:[%s1514_s4 + $0x38] sm:$0xff]  ;;  %v932_v47 = vpack.c.bf16 %v503_v42, %v501_v41  ;;  %v507_v50 = vld [vmem:[#allocation7 + $0xb0] sm:$0xff]  ;;  %v510_v51 = vld [vmem:[#allocation7 + $0xc8] sm:$0xff] }
  0x87   : > { %360 = vxpose.xlu1.b32.cont [4/16] %v328_v7, 128  ;;  %980 = vmatprep.subr.bf16.mxu1 %v922_v24  ;;  %v512_v52 = vld [vmem:[#allocation7 + $0xd8] sm:$0xff]  ;;  %v349_v53 = vld [vmem:[%s1514_s4 + $0xc0] sm:$0xff]  ;;  %v936_v55 = vpack.c.bf16 %v507_v50, %v505_v49  ;;  %v511_v58 = vld [vmem:[#allocation7 + $0xd0] sm:$0xff] }
  0x88   : > { %v333_v54 = vld [vmem:[%s1514_s4 + $0x40] sm:$0xff]  ;;  %v938_v56 = vpack.c.bf16 %v512_v52, %v510_v51  ;;  %v514_v59 = vld [vmem:[#allocation7 + $0xe8] sm:$0xff]  ;;  %v516_v60 = vld [vmem:[#allocation7 + $0xf8] sm:$0xff] }
  0x89   : > { %925 = vmatpush1.bf16.msra.mxu0 %v924_v31  ;;  %996 = vmatpush1.bf16.msra.mxu1 %v924_v31  ;;  %v509_v57 = vld [vmem:[#allocation7 + $0xc0] sm:$0xff]  ;;  %v350_v61 = vld [vmem:[%s1514_s4 + $0xc8] sm:$0xff]  ;;  %v942_v0 = vpack.c.bf16 %v516_v60, %v514_v59  ;;  %v515_v2 = vld [vmem:[#allocation7 + $0xf0] sm:$0xff] }
  0x8a   : > { %393 = vxpose.xlu0.b32.cont [5/16] %v345_v21, 128  ;;  %927 = vmatprep.subr.bf16.mxu0 %v926_v32  ;;  %v334_v62 = vld [vmem:[%s1514_s4 + $0x48] sm:$0xff]  ;;  %v940_v63 = vpack.c.bf16 %v511_v58, %v509_v57  ;;  %v513_v1 = vld [vmem:[#allocation7 + $0xe0] sm:$0xff]  ;;  %v520_v4 = vld [vmem:[#allocation7 + $0x118] sm:$0xff] }
  0x8b   : > { %361 = vxpose.xlu1.b32.cont [5/16] %v329_v22, 128  ;;  %981 = vmatprep.subr.bf16.mxu1 %v926_v32  ;;  %v518_v3 = vld [vmem:[#allocation7 + $0x108] sm:$0xff]  ;;  %v351_v5 = vld [vmem:[%s1514_s4 + $0xd0] sm:$0xff]  ;;  %v944_v7 = vpack.c.bf16 %v515_v2, %v513_v1  ;;  %v517_v9 = vld [vmem:[#allocation7 + $0x100] sm:$0xff] }
  0x8c   : > { %v335_v6 = vld [vmem:[%s1514_s4 + $0x50] sm:$0xff]  ;;  %v946_v8 = vpack.c.bf16 %v520_v4, %v518_v3  ;;  %v522_v11 = vld [vmem:[#allocation7 + $0x128] sm:$0xff]  ;;  %v524_v12 = vld [vmem:[#allocation7 + $0x138] sm:$0xff] }
  0x8d   : > { %929 = vmatpush1.bf16.msra.mxu0 %v928_v39  ;;  %997 = vmatpush1.bf16.msra.mxu1 %v928_v39  ;;  %v519_v10 = vld [vmem:[#allocation7 + $0x110] sm:$0xff]  ;;  %v352_v13 = vld [vmem:[%s1514_s4 + $0xd8] sm:$0xff]  ;;  %v950_v16 = vpack.c.bf16 %v524_v12, %v522_v11  ;;  %v521_v17 = vld [vmem:[#allocation7 + $0x120] sm:$0xff] }
  0x8e   : > { %394 = vxpose.xlu0.b32.cont [6/16] %v346_v29, 128  ;;  %931 = vmatprep.subr.bf16.mxu0 %v930_v40  ;;  %v336_v14 = vld [vmem:[%s1514_s4 + $0x58] sm:$0xff]  ;;  %v948_v15 = vpack.c.bf16 %v519_v10, %v517_v9  ;;  %v523_v18 = vld [vmem:[#allocation7 + $0x130] sm:$0xff]  ;;  %v526_v19 = vld [vmem:[#allocation7 + $0x148] sm:$0xff] }
  0x8f   : > { %362 = vxpose.xlu1.b32.cont [6/16] %v330_v30, 128  ;;  %982 = vmatprep.subr.bf16.mxu1 %v930_v40  ;;  %v528_v20 = vld [vmem:[#allocation7 + $0x158] sm:$0xff]  ;;  %v353_v21 = vld [vmem:[%s1514_s4 + $0xe0] sm:$0xff]  ;;  %v952_v23 = vpack.c.bf16 %v523_v18, %v521_v17  ;;  %v527_v26 = vld [vmem:[#allocation7 + $0x150] sm:$0xff] }
  0x90   : > { %v337_v22 = vld [vmem:[%s1514_s4 + $0x60] sm:$0xff]  ;;  %v954_v24 = vpack.c.bf16 %v528_v20, %v526_v19  ;;  %v530_v27 = vld [vmem:[#allocation7 + $0x168] sm:$0xff]  ;;  %v532_v28 = vld [vmem:[#allocation7 + $0x178] sm:$0xff] }
  0x91   : > { %933 = vmatpush1.bf16.msra.mxu0 %v932_v47  ;;  %998 = vmatpush1.bf16.msra.mxu1 %v932_v47  ;;  %v525_v25 = vld [vmem:[#allocation7 + $0x140] sm:$0xff]  ;;  %v354_v29 = vld [vmem:[%s1514_s4 + $0xe8] sm:$0xff]  ;;  %v958_v32 = vpack.c.bf16 %v532_v28, %v530_v27  ;;  %v531_v34 = vld [vmem:[#allocation7 + $0x170] sm:$0xff] }
  0x92   : > { %395 = vxpose.xlu0.b32.cont [7/16] %v347_v37, 128  ;;  %935 = vmatprep.subr.bf16.mxu0 %v934_v48  ;;  %v338_v30 = vld [vmem:[%s1514_s4 + $0x68] sm:$0xff]  ;;  %v956_v31 = vpack.c.bf16 %v527_v26, %v525_v25  ;;  %v529_v33 = vld [vmem:[#allocation7 + $0x160] sm:$0xff]  ;;  %v536_v36 = vld [vmem:[#allocation7 + $0x198] sm:$0xff] }
  0x93   : > { %363 = vxpose.xlu1.b32.cont [7/16] %v331_v38, 128  ;;  %983 = vmatprep.subr.bf16.mxu1 %v934_v48  ;;  %v534_v35 = vld [vmem:[#allocation7 + $0x188] sm:$0xff]  ;;  %v355_v37 = vld [vmem:[%s1514_s4 + $0xf0] sm:$0xff]  ;;  %v960_v39 = vpack.c.bf16 %v531_v34, %v529_v33  ;;  %v533_v41 = vld [vmem:[#allocation7 + $0x180] sm:$0xff] }
  0x94   : > { %v339_v38 = vld [vmem:[%s1514_s4 + $0x70] sm:$0xff]  ;;  %v962_v40 = vpack.c.bf16 %v536_v36, %v534_v35  ;;  %v538_v43 = vld [vmem:[#allocation7 + $0x1a8] sm:$0xff]  ;;  %v540_v44 = vld [vmem:[#allocation7 + $0x1b8] sm:$0xff] }
  0x95   : > { %937 = vmatpush1.bf16.msra.mxu0 %v936_v55  ;;  %999 = vmatpush1.bf16.msra.mxu1 %v936_v55  ;;  %v535_v42 = vld [vmem:[#allocation7 + $0x190] sm:$0xff]  ;;  %v966_v48 = vpack.c.bf16 %v540_v44, %v538_v43  ;;  %v537_v49 = vld [vmem:[#allocation7 + $0x1a0] sm:$0xff]  ;;  %v542_v51 = vld [vmem:[#allocation7 + $0x1c8] sm:$0xff] }
  0x96   : > { %396 = vxpose.xlu0.b32.cont [8/16] %v348_v45, 128  ;;  %939 = vmatprep.subr.bf16.mxu0 %v938_v56  ;;  %v356_v45 = vld [vmem:[%s1514_s4 + $0xf8] sm:$0xff]  ;;  %v964_v47 = vpack.c.bf16 %v535_v42, %v533_v41  ;;  %v539_v50 = vld [vmem:[#allocation7 + $0x1b0] sm:$0xff]  ;;  %v541_v55 = vld [vmem:[#allocation7 + $0x1c0] sm:$0xff] }
  0x97   : > { %364 = vxpose.xlu1.b32.cont [8/16] %v332_v46, 128  ;;  %984 = vmatprep.subr.bf16.mxu1 %v938_v56  ;;  %v340_v46 = vld [vmem:[%s1514_s4 + $0x78] sm:$0xff]  ;;  %v543_v56 = vld [vmem:[#allocation7 + $0x1d0] sm:$0xff]  ;;  %v546_v57 = vld [vmem:[#allocation7 + $0x1e8] sm:$0xff] }
  0x98   : > { %v544_v52 = vld [vmem:[#allocation7 + $0x1d8] sm:$0xff]  ;;  %v972_v59 = vpack.c.bf16 %v543_v56, %v541_v55  ;;  %v294_v1 = vld [vmem:[%s1506_s8 + $0x8] sm:$0xff]  ;;  %v307_v55 = vld [vmem:[%s1506_s8 + $0x70] sm:$0xff] }
  0x99   : > { %941 = vmatpush1.bf16.msra.mxu0 %v940_v63  ;;  %1000 = vmatpush1.bf16.msra.mxu1 %v940_v63  ;;  %v548_v58 = vld [vmem:[#allocation7 + $0x1f8] sm:$0xff] }
  0x9a   : > { %397 = vxpose.xlu0.b32.cont [9/16] %v349_v53, 128  ;;  %943 = vmatprep.subr.bf16.mxu0 %v942_v0  ;;  %v968_v53 = vpack.c.bf16 %v539_v50, %v537_v49  ;;  %v974_v60 = vpack.c.bf16 %v548_v58, %v546_v57 }
  0x9b   : > { %365 = vxpose.xlu1.b32.cont [9/16] %v333_v54, 128  ;;  %985 = vmatprep.subr.bf16.mxu1 %v942_v0  ;;  %v970_v54 = vpack.c.bf16 %v544_v52, %v542_v51  ;;  %v293_v0 = vld [vmem:[%s1506_s8] sm:$0xff] }
  0x9d   : > { %945 = vmatpush1.bf16.msra.mxu0 %v944_v7  ;;  %1001 = vmatpush1.bf16.msra.mxu1 %v944_v7  ;;  %v295_v7 = vld [vmem:[%s1506_s8 + $0x10] sm:$0xff] }
  0x9e   : > { %398 = vxpose.xlu0.b32.cont [10/16] %v350_v61, 128  ;;  %947 = vmatprep.subr.bf16.mxu0 %v946_v8  ;;  %v545_v61 = vld [vmem:[#allocation7 + $0x1e0] sm:$0xff] }
  0x9f   : > { %366 = vxpose.xlu1.b32.cont [10/16] %v334_v62, 128  ;;  %986 = vmatprep.subr.bf16.mxu1 %v946_v8  ;;  %v547_v62 = vld [vmem:[#allocation7 + $0x1f0] sm:$0xff] }
  0xa0   : > { %v976_v63 = vpack.c.bf16 %v547_v62, %v545_v61  ;;  %v309_v62 = vld [vmem:[%s1506_s8 + $0x80] sm:$0xff] }
  0xa1   : > { %949 = vmatpush1.bf16.msra.mxu0 %v948_v15  ;;  %1002 = vmatpush1.bf16.msra.mxu1 %v948_v15  ;;  %v297_v15 = vld [vmem:[%s1506_s8 + $0x20] sm:$0xff] }
  0xa2   : > { %399 = vxpose.xlu0.b32.cont [11/16] %v351_v5, 128  ;;  %951 = vmatprep.subr.bf16.mxu0 %v950_v16 }
  0xa3   : > { %367 = vxpose.xlu1.b32.cont [11/16] %v335_v6, 128  ;;  %987 = vmatprep.subr.bf16.mxu1 %v950_v16  ;;  %v296_v6 = vld [vmem:[%s1506_s8 + $0x18] sm:$0xff] }
  0xa5   : > { %953 = vmatpush1.bf16.msra.mxu0 %v952_v23  ;;  %1003 = vmatpush1.bf16.msra.mxu1 %v952_v23  ;;  %v299_v23 = vld [vmem:[%s1506_s8 + $0x30] sm:$0xff] }
  0xa6   : > { %400 = vxpose.xlu0.b32.cont [12/16] %v352_v13, 128  ;;  %955 = vmatprep.subr.bf16.mxu0 %v954_v24 }
  0xa7   : > { %368 = vxpose.xlu1.b32.cont [12/16] %v336_v14, 128  ;;  %988 = vmatprep.subr.bf16.mxu1 %v954_v24  ;;  %v298_v14 = vld [vmem:[%s1506_s8 + $0x28] sm:$0xff] }
  0xa9   : > { %957 = vmatpush1.bf16.msra.mxu0 %v956_v31  ;;  %1004 = vmatpush1.bf16.msra.mxu1 %v956_v31  ;;  %v301_v31 = vld [vmem:[%s1506_s8 + $0x40] sm:$0xff] }
  0xaa   : > { %401 = vxpose.xlu0.b32.cont [13/16] %v353_v21, 128  ;;  %959 = vmatprep.subr.bf16.mxu0 %v958_v32 }
  0xab   : > { %369 = vxpose.xlu1.b32.cont [13/16] %v337_v22, 128  ;;  %989 = vmatprep.subr.bf16.mxu1 %v958_v32  ;;  %v300_v22 = vld [vmem:[%s1506_s8 + $0x38] sm:$0xff] }
  0xad   : > { %961 = vmatpush1.bf16.msra.mxu0 %v960_v39  ;;  %1005 = vmatpush1.bf16.msra.mxu1 %v960_v39  ;;  %v303_v39 = vld [vmem:[%s1506_s8 + $0x50] sm:$0xff] }
  0xae   : > { %402 = vxpose.xlu0.b32.cont [14/16] %v354_v29, 128  ;;  %963 = vmatprep.subr.bf16.mxu0 %v962_v40 }
  0xaf   : > { %370 = vxpose.xlu1.b32.cont [14/16] %v338_v30, 128  ;;  %990 = vmatprep.subr.bf16.mxu1 %v962_v40  ;;  %v302_v30 = vld [vmem:[%s1506_s8 + $0x48] sm:$0xff] }
  0xb1   : > { %965 = vmatpush1.bf16.msra.mxu0 %v964_v47  ;;  %1006 = vmatpush1.bf16.msra.mxu1 %v964_v47  ;;  %v305_v47 = vld [vmem:[%s1506_s8 + $0x60] sm:$0xff] }
  0xb2   : > { %403 = vxpose.xlu0.b32.cont [15/16] %v355_v37, 128  ;;  %967 = vmatprep.subr.bf16.mxu0 %v966_v48 }
  0xb3   : > { %371 = vxpose.xlu1.b32.cont [15/16] %v339_v38, 128  ;;  %991 = vmatprep.subr.bf16.mxu1 %v966_v48  ;;  %v304_v38 = vld [vmem:[%s1506_s8 + $0x58] sm:$0xff] }
  0xb5   : > { %969 = vmatpush1.bf16.msra.mxu0 %v968_v53  ;;  %1007 = vmatpush1.bf16.msra.mxu1 %v968_v53 }
  0xb6   : > { %404 = vxpose.xlu0.b32.end [16/16] %v356_v45, 128  ;;  %971 = vmatprep.subr.bf16.mxu0 %v970_v54 }
  0xb7   : > { %372 = vxpose.xlu1.b32.end [16/16] %v340_v46, 128  ;;  %992 = vmatprep.subr.bf16.mxu1 %v970_v54  ;;  %v306_v46 = vld [vmem:[%s1506_s8 + $0x68] sm:$0xff]  ;;  %v308_v54 = vld [vmem:[%s1506_s8 + $0x78] sm:$0xff] }
  0xb9   : > { %973 = vmatpush1.bf16.msra.mxu0 %v972_v59  ;;  %1008 = vmatpush1.bf16.msra.mxu1 %v972_v59 }
  0xba   : > { %975 = vmatprep.subr.bf16.mxu0 %v974_v60  ;;  %993 = vmatprep.subr.bf16.mxu1 %v974_v60 }
  0xbd   : > { %977 = vmatpush1.bf16.msra.mxu0 %v976_v63  ;;  %1009 = vmatpush1.bf16.msra.mxu1 %v976_v63  ;;  %v310_v63 = vld [vmem:[%s1506_s8 + $0x88] sm:$0xff] }
  0xfa   : > { %v405_v2 = vpop.trf.xlu0 }
  0xfb   : > { %v373_v3 = vpop.trf.xlu1  ;;  %v422_v5 = vadd.f32 %v405_v2, %v294_v1 }
  0xfc   : > { %v421_v4 = vadd.f32 %v373_v3, %v293_v0 }
  0xfd   : > { %v454_v9 = vmul.f32 0.5, %v422_v5 }
  0xfe   : > { %v453_v8 = vmul.f32 0.5, %v421_v4  ;;  %v406_v10 = vpop.trf.xlu0 }
  0xff   : > { %v374_v11 = vpop.trf.xlu1  ;;  %v424_v12 = vadd.f32 %v406_v10, %v296_v6  ;;  %613 = vmatprep.mubr.f32.mxu0 %v454_v9  ;;  %v312_v6 = vld [vmem:[%s1506_s8 + $0x98] sm:$0xff] }
 0x100   : > { %v423_v13 = vadd.f32 %v374_v11, %v295_v7  ;;  %614 = vmatmul.mubr.f32.vlgmr.msra.gmra.mrb[0].mxu0 %v453_v8  ;;  %v311_v7 = vld [vmem:[%s1506_s8 + $0x90] sm:$0xff] }
 0x101   : > { %v456_v16 = vmul.f32 0.5, %v424_v12 }
 0x102   : > { %v455_v17 = vmul.f32 0.5, %v423_v13  ;;  %v407_v18 = vpop.trf.xlu0 }
 0x103   : > { %v375_v19 = vpop.trf.xlu1  ;;  %v426_v20 = vadd.f32 %v407_v18, %v298_v14  ;;  %619 = vmatprep.mubr.f32.mxu0 %v456_v16  ;;  %v314_v14 = vld [vmem:[%s1506_s8 + $0xa8] sm:$0xff] }
 0x104   : > { %v425_v21 = vadd.f32 %v375_v19, %v297_v15  ;;  %620 = vmatmul.mubr.f32.gmra.mrb[2].mxu0 %v455_v17  ;;  %v313_v15 = vld [vmem:[%s1506_s8 + $0xa0] sm:$0xff] }
 0x105   : > { %v458_v24 = vmul.f32 0.5, %v426_v20 }
 0x106   : > { %v457_v25 = vmul.f32 0.5, %v425_v21  ;;  %v408_v26 = vpop.trf.xlu0 }
 0x107   : > { %v376_v27 = vpop.trf.xlu1  ;;  %v428_v28 = vadd.f32 %v408_v26, %v300_v22  ;;  %625 = vmatprep.mubr.f32.mxu0 %v458_v24  ;;  %v316_v22 = vld [vmem:[%s1506_s8 + $0xb8] sm:$0xff] }
 0x108   : > { %v427_v29 = vadd.f32 %v376_v27, %v299_v23  ;;  %626 = vmatmul.mubr.f32.gmra.mrb[4].mxu0 %v457_v25  ;;  %v315_v23 = vld [vmem:[%s1506_s8 + $0xb0] sm:$0xff] }
 0x109   : > { %v460_v32 = vmul.f32 0.5, %v428_v28 }
 0x10a   : > { %v459_v33 = vmul.f32 0.5, %v427_v29  ;;  %v409_v34 = vpop.trf.xlu0 }
 0x10b   : > { %v377_v35 = vpop.trf.xlu1  ;;  %v430_v36 = vadd.f32 %v409_v34, %v302_v30  ;;  %631 = vmatprep.mubr.f32.mxu0 %v460_v32  ;;  %v318_v30 = vld [vmem:[%s1506_s8 + $0xc8] sm:$0xff] }
 0x10c   : > { %v429_v37 = vadd.f32 %v377_v35, %v301_v31  ;;  %632 = vmatmul.mubr.f32.gmra.mrb[6].mxu0 %v459_v33  ;;  %v317_v31 = vld [vmem:[%s1506_s8 + $0xc0] sm:$0xff] }
 0x10d   : > { %v462_v40 = vmul.f32 0.5, %v430_v36 }
 0x10e   : > { %v461_v41 = vmul.f32 0.5, %v429_v37  ;;  %v410_v42 = vpop.trf.xlu0 }
 0x10f   : > { %v378_v43 = vpop.trf.xlu1  ;;  %v432_v44 = vadd.f32 %v410_v42, %v304_v38  ;;  %637 = vmatprep.mubr.f32.mxu0 %v462_v40  ;;  %v320_v38 = vld [vmem:[%s1506_s8 + $0xd8] sm:$0xff] }
 0x110   : > { %v431_v45 = vadd.f32 %v378_v43, %v303_v39  ;;  %638 = vmatmul.mubr.f32.gmra.mrb[8].mxu0 %v461_v41  ;;  %v319_v39 = vld [vmem:[%s1506_s8 + $0xd0] sm:$0xff] }
 0x111   : > { %v464_v48 = vmul.f32 0.5, %v432_v44 }
 0x112   : > { %v463_v49 = vmul.f32 0.5, %v431_v45  ;;  %v411_v50 = vpop.trf.xlu0 }
 0x113   : > { %v379_v51 = vpop.trf.xlu1  ;;  %v434_v52 = vadd.f32 %v411_v50, %v306_v46  ;;  %643 = vmatprep.mubr.f32.mxu0 %v464_v48  ;;  %v322_v46 = vld [vmem:[%s1506_s8 + $0xe8] sm:$0xff] }
 0x114   : > { %v433_v53 = vadd.f32 %v379_v51, %v305_v47  ;;  %644 = vmatmul.mubr.f32.gmra.mrb[10].mxu0 %v463_v49  ;;  %v321_v47 = vld [vmem:[%s1506_s8 + $0xe0] sm:$0xff] }
 0x115   : > { %v466_v56 = vmul.f32 0.5, %v434_v52 }
 0x116   : > { %v465_v57 = vmul.f32 0.5, %v433_v53  ;;  %v412_v58 = vpop.trf.xlu0 }
 0x117   : > { %v380_v59 = vpop.trf.xlu1  ;;  %v436_v60 = vadd.f32 %v412_v58, %v308_v54  ;;  %649 = vmatprep.mubr.f32.mxu0 %v466_v56  ;;  %v324_v54 = vld [vmem:[%s1506_s8 + $0xf8] sm:$0xff] }
 0x118   : > { %v435_v61 = vadd.f32 %v380_v59, %v307_v55  ;;  %650 = vmatmul.mubr.f32.gmra.mrb[12].mxu0 %v465_v57  ;;  %v323_v55 = vld [vmem:[%s1506_s8 + $0xf0] sm:$0xff] }
 0x119   : > { %v468_v0 = vmul.f32 0.5, %v436_v60 }
 0x11a   : > { %v467_v1 = vmul.f32 0.5, %v435_v61  ;;  %v413_v2 = vpop.trf.xlu0 }
 0x11b   : > { %v381_v3 = vpop.trf.xlu1  ;;  %655 = vmatprep.mubr.f32.mxu0 %v468_v0  ;;  %v438_v5 = vadd.f32 %v413_v2, %v310_v63 }
 0x11c   : > { %v437_v4 = vadd.f32 %v381_v3, %v309_v62  ;;  %656 = vmatmul.mubr.f32.gmra.mrb[14].mxu0 %v467_v1 }
 0x11d   : > { %v470_v9 = vmul.f32 0.5, %v438_v5 }
 0x11e   : > { %v469_v8 = vmul.f32 0.5, %v437_v4  ;;  %v414_v10 = vpop.trf.xlu0 }
 0x11f   : > { %v382_v11 = vpop.trf.xlu1  ;;  %v440_v12 = vadd.f32 %v414_v10, %v312_v6  ;;  %661 = vmatprep.mubr.f32.mxu1 %v470_v9 }
 0x120   : > { %v439_v13 = vadd.f32 %v382_v11, %v311_v7  ;;  %662 = vmatmul.mubr.f32.vlgmr.msra.gmra.mrb[0].mxu1 %v469_v8 }
 0x121   : > { %v472_v16 = vmul.f32 0.5, %v440_v12 }
 0x122   : > { %v471_v17 = vmul.f32 0.5, %v439_v13  ;;  %v415_v18 = vpop.trf.xlu0 }
 0x123   : > { %v383_v19 = vpop.trf.xlu1  ;;  %v442_v20 = vadd.f32 %v415_v18, %v314_v14  ;;  %667 = vmatprep.mubr.f32.mxu1 %v472_v16 }
 0x124   : > { %v441_v21 = vadd.f32 %v383_v19, %v313_v15  ;;  %668 = vmatmul.mubr.f32.gmra.mrb[2].mxu1 %v471_v17 }
 0x125   : > { %v474_v24 = vmul.f32 0.5, %v442_v20 }
 0x126   : > { %v473_v25 = vmul.f32 0.5, %v441_v21  ;;  %v416_v26 = vpop.trf.xlu0 }
 0x127   : > { %v384_v27 = vpop.trf.xlu1  ;;  %v444_v28 = vadd.f32 %v416_v26, %v316_v22  ;;  %673 = vmatprep.mubr.f32.mxu1 %v474_v24 }
 0x128   : > { %v443_v29 = vadd.f32 %v384_v27, %v315_v23  ;;  %674 = vmatmul.mubr.f32.gmra.mrb[4].mxu1 %v473_v25 }
 0x129   : > { %v476_v32 = vmul.f32 0.5, %v444_v28 }
 0x12a   : > { %v475_v33 = vmul.f32 0.5, %v443_v29  ;;  %v417_v34 = vpop.trf.xlu0 }
 0x12b   : > { %v385_v35 = vpop.trf.xlu1  ;;  %v446_v36 = vadd.f32 %v417_v34, %v318_v30  ;;  %679 = vmatprep.mubr.f32.mxu1 %v476_v32 }
 0x12c   : > { %v445_v37 = vadd.f32 %v385_v35, %v317_v31  ;;  %680 = vmatmul.mubr.f32.gmra.mrb[6].mxu1 %v475_v33 }
 0x12d   : > { %v478_v40 = vmul.f32 0.5, %v446_v36 }
 0x12e   : > { %v477_v41 = vmul.f32 0.5, %v445_v37  ;;  %v418_v42 = vpop.trf.xlu0 }
 0x12f   : > { %v386_v43 = vpop.trf.xlu1  ;;  %v448_v44 = vadd.f32 %v418_v42, %v320_v38  ;;  %685 = vmatprep.mubr.f32.mxu1 %v478_v40 }
 0x130   : > { %v447_v45 = vadd.f32 %v386_v43, %v319_v39  ;;  %686 = vmatmul.mubr.f32.gmra.mrb[8].mxu1 %v477_v41 }
 0x131   : > { %v480_v48 = vmul.f32 0.5, %v448_v44 }
 0x132   : > { %v479_v49 = vmul.f32 0.5, %v447_v45  ;;  %v419_v50 = vpop.trf.xlu0 }
 0x133   : > { %v387_v51 = vpop.trf.xlu1  ;;  %v450_v52 = vadd.f32 %v419_v50, %v322_v46  ;;  %691 = vmatprep.mubr.f32.mxu1 %v480_v48 }
 0x134   : > { %v449_v53 = vadd.f32 %v387_v51, %v321_v47  ;;  %692 = vmatmul.mubr.f32.gmra.mrb[10].mxu1 %v479_v49 }
 0x135   : > { %v482_v56 = vmul.f32 0.5, %v450_v52 }
 0x136   : > { %v481_v57 = vmul.f32 0.5, %v449_v53  ;;  %v420_v58 = vpop.trf.xlu0 }
 0x137   : > { %v388_v59 = vpop.trf.xlu1  ;;  %v452_v60 = vadd.f32 %v420_v58, %v324_v54  ;;  %697 = vmatprep.mubr.f32.mxu1 %v482_v56 }
 0x138   : > { %v451_v61 = vadd.f32 %v388_v59, %v323_v55  ;;  %698 = vmatmul.mubr.f32.gmra.mrb[12].mxu1 %v481_v57 }
 0x139   : > { %v484_v62 = vmul.f32 0.5, %v452_v60 }
 0x13a   : > { %v483_v63 = vmul.f32 0.5, %v451_v61 }
 0x13b   : > { %703 = vmatprep.mubr.f32.mxu1 %v484_v62 }
 0x13c   : > { %704 = vmatmul.mubr.f32.gmra.mrb[14].mxu1 %v483_v63 }
 0x1d3   : > { %v615_v0 = vpop.f32.mrb[0].mxu0 }
 0x1d4   : > { %710 = vst [vmem:[%s1589_s18] sm:$0xff] %v615_v0  ;;  %v617_v1 = vpop.f32.mrb[1].mxu0 }
 0x1d5   : > { %711 = vst [vmem:[%s1589_s18 + $0x8] sm:$0xff] %v617_v1 }
 0x1d7   : > { %v621_v2 = vpop.f32.mrb[2].mxu0 }
 0x1d8   : > { %712 = vst [vmem:[%s1589_s18 + $0x10] sm:$0xff] %v621_v2  ;;  %v623_v3 = vpop.f32.mrb[3].mxu0 }
 0x1d9   : > { %713 = vst [vmem:[%s1589_s18 + $0x18] sm:$0xff] %v623_v3 }
 0x1db   : > { %v627_v4 = vpop.f32.mrb[4].mxu0 }
 0x1dc   : > { %714 = vst [vmem:[%s1589_s18 + $0x20] sm:$0xff] %v627_v4  ;;  %v629_v5 = vpop.f32.mrb[5].mxu0 }
 0x1dd   : > { %715 = vst [vmem:[%s1589_s18 + $0x28] sm:$0xff] %v629_v5 }
 0x1df   : > { %v633_v6 = vpop.f32.mrb[6].mxu0 }
 0x1e0   : > { %716 = vst [vmem:[%s1589_s18 + $0x30] sm:$0xff] %v633_v6  ;;  %v635_v7 = vpop.f32.mrb[7].mxu0 }
 0x1e1   : > { %717 = vst [vmem:[%s1589_s18 + $0x38] sm:$0xff] %v635_v7 }
 0x1e3   : > { %v639_v8 = vpop.f32.mrb[8].mxu0 }
 0x1e4   : > { %718 = vst [vmem:[%s1589_s18 + $0x40] sm:$0xff] %v639_v8  ;;  %v641_v9 = vpop.f32.mrb[9].mxu0 }
 0x1e5   : > { %719 = vst [vmem:[%s1589_s18 + $0x48] sm:$0xff] %v641_v9 }
 0x1e7   : > { %v645_v10 = vpop.f32.mrb[10].mxu0 }
 0x1e8   : > { %720 = vst [vmem:[%s1589_s18 + $0x50] sm:$0xff] %v645_v10  ;;  %v647_v11 = vpop.f32.mrb[11].mxu0 }
 0x1e9   : > { %721 = vst [vmem:[%s1589_s18 + $0x58] sm:$0xff] %v647_v11 }
 0x1eb   : > { %v651_v12 = vpop.f32.mrb[12].mxu0 }
 0x1ec   : > { %722 = vst [vmem:[%s1589_s18 + $0x60] sm:$0xff] %v651_v12  ;;  %v653_v13 = vpop.f32.mrb[13].mxu0 }
 0x1ed   : > { %723 = vst [vmem:[%s1589_s18 + $0x68] sm:$0xff] %v653_v13 }
 0x1ef   : > { %v657_v14 = vpop.f32.mrb[14].mxu0 }
 0x1f0   : > { %724 = vst [vmem:[%s1589_s18 + $0x70] sm:$0xff] %v657_v14  ;;  %v659_v15 = vpop.f32.mrb[15].mxu0 }
 0x1f1   : > { %725 = vst [vmem:[%s1589_s18 + $0x78] sm:$0xff] %v659_v15 }
 0x1f3   : > { %v663_v16 = vpop.f32.mrb[0].mxu1 }
 0x1f4   : > { %726 = vst [vmem:[%s1589_s18 + $0x80] sm:$0xff] %v663_v16  ;;  %v665_v17 = vpop.f32.mrb[1].mxu1 }
 0x1f5   : > { %727 = vst [vmem:[%s1589_s18 + $0x88] sm:$0xff] %v665_v17 }
 0x1f7   : > { %v669_v18 = vpop.f32.mrb[2].mxu1 }
 0x1f8   : > { %728 = vst [vmem:[%s1589_s18 + $0x90] sm:$0xff] %v669_v18  ;;  %v671_v19 = vpop.f32.mrb[3].mxu1 }
 0x1f9   : > { %729 = vst [vmem:[%s1589_s18 + $0x98] sm:$0xff] %v671_v19 }
 0x1fb   : > { %v675_v20 = vpop.f32.mrb[4].mxu1 }
 0x1fc   : > { %730 = vst [vmem:[%s1589_s18 + $0xa0] sm:$0xff] %v675_v20  ;;  %v677_v21 = vpop.f32.mrb[5].mxu1 }
 0x1fd   : > { %731 = vst [vmem:[%s1589_s18 + $0xa8] sm:$0xff] %v677_v21 }
 0x1ff   : > { %v681_v22 = vpop.f32.mrb[6].mxu1 }
 0x200   : > { %732 = vst [vmem:[%s1589_s18 + $0xb0] sm:$0xff] %v681_v22  ;;  %v683_v23 = vpop.f32.mrb[7].mxu1 }
 0x201   : > { %733 = vst [vmem:[%s1589_s18 + $0xb8] sm:$0xff] %v683_v23 }
 0x203   : > { %v687_v24 = vpop.f32.mrb[8].mxu1 }
 0x204   : > { %734 = vst [vmem:[%s1589_s18 + $0xc0] sm:$0xff] %v687_v24  ;;  %v689_v25 = vpop.f32.mrb[9].mxu1 }
 0x205   : > { %735 = vst [vmem:[%s1589_s18 + $0xc8] sm:$0xff] %v689_v25 }
 0x207   : > { %v693_v26 = vpop.f32.mrb[10].mxu1 }
 0x208   : > { %736 = vst [vmem:[%s1589_s18 + $0xd0] sm:$0xff] %v693_v26  ;;  %v695_v27 = vpop.f32.mrb[11].mxu1 }
 0x209   : > { %737 = vst [vmem:[%s1589_s18 + $0xd8] sm:$0xff] %v695_v27 }
 0x20b   : > { %v699_v28 = vpop.f32.mrb[12].mxu1 }
 0x20c   : > { %738 = vst [vmem:[%s1589_s18 + $0xe0] sm:$0xff] %v699_v28  ;;  %v701_v29 = vpop.f32.mrb[13].mxu1 }
 0x20d   : > { %739 = vst [vmem:[%s1589_s18 + $0xe8] sm:$0xff] %v701_v29 }
 0x20f   : > { %v705_v30 = vpop.f32.mrb[14].mxu1 }
 0x210   : > { %740 = vst [vmem:[%s1589_s18 + $0xf0] sm:$0xff] %v705_v30  ;;  %v707_v31 = vpop.f32.mrb[15].mxu1 }
 0x211   : > { %741 = vst [vmem:[%s1589_s18 + $0xf8] sm:$0xff] %v707_v31 }
 0x212   : > { %1195 = shalt.err (!%p1192_p8)
}
 0x213   : > { %s1196_s6 = scalar_lea.hbm %s1626_s19, 4096  ;;  %s1200_s8 = scalar_lea.hbm %s1682_s3, 8192 }
 0x214   : > { %p1197_p11 = scmp.ne.s32.totalorder %s1626_s19, %s1196_s6  ;;  %p1201_p6 = scmp.lt.u32.totalorder %s1626_s19, %s1682_s3 }
 0x215   : > { %p1202_p13 = scmp.lt.u32.totalorder %s1200_s8, %s1196_s6  ;;  %p1204_p5 = scmp.lt.u32.totalorder %s1196_s6, %s1626_s19 }
 0x216   : > { %p1198_p12 = pnand %p1197_p11, %p1399_p10 }
 0x217   : > { %p1203_p0 = por %p1202_p13, %p1201_p6 }
 0x218   : > { %p1199_p3 = pneg %p1198_p12 }
 0x219   : > { %p1205_p9 = por %p1204_p5, %p1203_p0 }
 0x21b   : > { %p1206_p1 = pnand %p1205_p9, %p1199_p3 }
 0x21d   : > { %1209 = shalt.err (!%p1206_p1)
}
 0x21e   : > { %s1282_s4 = smov 256   ;;  %s1283_s18 = smov 16  }
 0x21f   : > { %1018 = dma.vmem_to_hbm [thread:$0]  (%p1399_p10), %s1628_s9, 4096, %s1626_s19, %s743_s5, %s1282_s4, %s1282_s4, %s1283_s18  }
 0x220 PF: > { %s774_s20 = sand.u32 1, %s1252_s12   ;;  %p1705_p2 = scmp.ne.s32.totalorder %s1691_s21, 0 }
 0x221   : > { %p1706_p7 = scmp.ge.s32.totalorder %s1272_s17, 2  ;;  %s775_s24 = scalar_lea.sflag [#allocation4], %s774_s20 }
 0x223   : > { %p1032_p4 = pnand %p1706_p7, %p1705_p2 }
 0x225   : > { %1247 = dma.done.wait (!%p1032_p4), %s775_s24, 4096  }
 0x226   : > { %1249 = vsyncadd (!%p1032_p4), %s775_s24, 4294963200  ;;  %s22_s17 = sadd.s32 1, %s1272_s17   ;;  %s1707_s12 = smov %s1256_s13 }
 0x227   : > { %p19_p8 = scmp.ge.s32.totalorder %s22_s17, 4   ;;  %s1708_s13 = smov %s1260_s14 }
 0x228   : > { %s1709_s14 = smov %s1408_s29  ;;  %s1710_s15 = smov %s1268_s16 }
 0x229   : > { %s1711_s16 = smov %s1713_s26  ;;  %21 = sbr.rel (!%p19_p8) target bundleno = 10 (0xa), region = 95 }
 0x230   :  { %780 = vsyncpa [#allocation3], 1 }
 0x231   :  { %782 = vsyncpa [#allocation3 + $0x1], 1 }
 0x232   :  { %783 = vsyncpa [#allocation6], 1 }
 0x233   :  { %785 = vsyncpa [#allocation6 + $0x1], 1 }
 0x234   :  { %786 = vsyncpa [#allocation4], 1 }
 0x235   :  { %788 = vsyncpa [#allocation4 + $0x1], 1 }

</bundles_post_ra>
